<compile_context>
chip_gen: v5e
topology: v5e:2x2
jax: 0.10.0
libtpu: 0.0.40
codegen_flags: <defaults>
</compile_context>

<pallas_src>
import functools

import numpy as np

import jax
import jax.numpy as jnp
from jax.experimental import pallas as pl
from jax.experimental.pallas import tpu as pltpu


def _round_up(x: int, m: int) -> int:
    return ((x + m - 1) // m) * m


def _pad2d(a, rows: int, cols: int):
    pr, pc = rows - a.shape[0], cols - a.shape[1]
    if pr == 0 and pc == 0:
        return a
    return jnp.pad(a, ((0, pr), (0, pc)))


def _vmem_capacity_bytes() -> int:
    """Per-core VMEM capacity; conservative fallback if the query fails."""
    try:
        info = pltpu.get_tpu_info()
        cap = getattr(info, "vmem_capacity_bytes", None)
        if cap:
            return int(cap)
    except Exception:  # non-TPU backend / interpret mode etc.
        pass
    return 64 << 20  # assume the tightest case (v7x: 64 MiB per TensorCore)


def _vmem_estimate(tm: int, th: int, n_pad: int, x_isz: int, out_isz: int) -> int:
    """Conservative bytes of VMEM the pipeline + kernel body will use."""
    return (2 * tm * n_pad * x_isz        # x row tile, double-buffered (input dtype)
            + 2 * tm * n_pad * out_isz    # output tile, double-buffered
            + 2 * n_pad * th * 2          # W1 chunk (bf16), double-buffered
            + 2 * th * n_pad * 2          # W2 chunk (bf16), double-buffered
            + 2 * (th + n_pad) * 4        # b1 / b2 chunks (f32)
            + tm * n_pad * 2              # bf16 x scratch
            + tm * n_pad * 4              # f32 accumulator scratch
            + tm * th * (4 + 2))          # live f32 hidden + its bf16 copy


def _select_tiling(M, n_embd, hidden, x_isz, out_isz, budget, tile_m, tile_h):
    n_pad = _round_up(n_embd, 128)
    h_full = _round_up(hidden, 128)

    if tile_m is not None:
        tm_candidates = (max(8, _round_up(tile_m, 8)),)
    elif M <= 256:
        tm_candidates = (M,)              # block dim == full array dim: always legal
    elif M < 1024:
        tm_candidates = (256, 128)
    else:
        tm_candidates = (512, 256, 128)   # 512 on big-VMEM chips; budget enforces v7x

    if tile_h is not None:
        th_candidates = (min(h_full, max(128, _round_up(tile_h, 128))),)
    else:
        # Prefer fully-resident weights (th == h_full: constant block index =>
        # W1/W2 DMA'd from HBM exactly once).  Fall back to streaming chunks
        # (divisors of h_full, largest first) when VMEM is tight; larger tm is
        # preferred there to amortize the per-row-tile weight re-fetch.
        th_candidates = (h_full,) + tuple(
            t for t in (2048, 1024, 512, 256, 128)
            if t < h_full and h_full % t == 0)

    for th in th_candidates:
        for tm in tm_candidates:
            if _vmem_estimate(tm, th, n_pad, x_isz, out_isz) <= budget:
                return tm, th, n_pad
    # Last resort: smallest candidates (vmem_limit below is still capped).
    return tm_candidates[-1], th_candidates[-1], n_pad


def _ffwd_kernel(x_ref, w1_ref, b1_ref, w2_ref, b2_ref, o_ref, xb_ref, acc_ref):
    # x_ref : (tm, n_pad) input dtype     w1_ref: (n_pad, th) bf16
    # b1_ref: (1, th) f32                 w2_ref: (th, n_pad) bf16
    # b2_ref: (1, n_pad) f32              o_ref : (tm, n_pad) out dtype
    # xb_ref: (tm, n_pad) bf16 scratch    acc_ref: (tm, n_pad) f32 scratch
    h = pl.program_id(1)

    @pl.when(h == 0)
    def _():
        # Cast the activations to bf16 once per row tile (in-kernel: no extra
        # HBM round trip in the wrapper) and zero the f32 accumulator.
        xb_ref[...] = x_ref[...].astype(xb_ref.dtype)
        acc_ref[...] = jnp.zeros_like(acc_ref)

    hid = jnp.dot(xb_ref[...], w1_ref[...], preferred_element_type=jnp.float32)
    hid = jnp.maximum(hid + b1_ref[...], 0.0)          # bias + ReLU in f32 (VPU)
    acc_ref[...] += jnp.dot(hid.astype(w2_ref.dtype), w2_ref[...],
                            preferred_element_type=jnp.float32)

    @pl.when(h == pl.num_programs(1) - 1)
    def _():
        # Dropout is identity in eval mode.
        o_ref[...] = (acc_ref[...] + b2_ref[...]).astype(o_ref.dtype)


@functools.partial(jax.jit, static_argnames=("tile_m", "tile_h", "out_dtype"))
def _feed_forward_impl(x, w1, b1, w2, b2, *, tile_m, tile_h, out_dtype):
    B, T, n_embd = x.shape
    hidden = w1.shape[1]
    M = B * T

    x_isz = x.dtype.itemsize
    out_isz = np.dtype(out_dtype).itemsize

    vmem_cap = _vmem_capacity_bytes()
    budget = int(0.80 * vmem_cap)         # ~52 MiB on v7x, ~102 MiB on v5e/v6e

    tm, th, n_pad = _select_tiling(M, n_embd, hidden, x_isz, out_isz,
                                   budget, tile_m, tile_h)
    h_pad = _round_up(hidden, th)
    n_h = h_pad // th

    est = _vmem_estimate(tm, th, n_pad, x_isz, out_isz)
    vmem_limit = int(min(max(1.25 * est + (2 << 20), 16 << 20),
                         0.90 * vmem_cap))

    compute_dtype = jnp.bfloat16

    # Activations: reshape only (free); zero-pad the feature dim only when it
    # is not lane-aligned.  No dtype cast and no M padding in the wrapper.
    x2 = x.reshape(M, n_embd)
    if n_pad != n_embd:
        x2 = jnp.pad(x2, ((0, 0), (0, n_pad - n_embd)))

    # Weights/biases: pad + cast once (zero padding is exact for this op).
    w1_p = _pad2d(w1, n_pad, h_pad).astype(compute_dtype)
    w2_p = _pad2d(w2, h_pad, n_pad).astype(compute_dtype)
    b1_p = _pad2d(b1.reshape(1, hidden).astype(jnp.float32), 1, h_pad)
    b2_p = _pad2d(b2.reshape(1, n_embd).astype(jnp.float32), 1, n_pad)

    out2d = pl.pallas_call(
        _ffwd_kernel,
        out_shape=jax.ShapeDtypeStruct((M, n_pad), out_dtype),
        grid_spec=pltpu.PrefetchScalarGridSpec(
            num_scalar_prefetch=0,
            grid=(pl.cdiv(M, tm), n_h),          # M tiles (parallel) x h chunks
            in_specs=[
                pl.BlockSpec((tm, n_pad), lambda i, h: (i, 0)),   # x rows
                pl.BlockSpec((n_pad, th), lambda i, h: (0, h)),   # W1 col chunk
                pl.BlockSpec((1, th),     lambda i, h: (0, h)),   # b1 chunk
                pl.BlockSpec((th, n_pad), lambda i, h: (h, 0)),   # W2 row chunk
                pl.BlockSpec((1, n_pad),  lambda i, h: (0, 0)),   # b2
            ],
            out_specs=pl.BlockSpec((tm, n_pad), lambda i, h: (i, 0)),
            scratch_shapes=[pltpu.VMEM((tm, n_pad), compute_dtype),  # bf16 x
                            pltpu.VMEM((tm, n_pad), jnp.float32)],   # f32 acc
        ),
        compiler_params=pltpu.CompilerParams(
            dimension_semantics=("parallel", "arbitrary"),
            vmem_limit_bytes=vmem_limit),
    )(x2, w1_p, b1_p, w2_p, b2_p)

    return out2d[:, :n_embd].reshape(B, T, n_embd)


def feed_forward(x, w1, b1, w2, b2, *, tile_m=None, tile_h=None, out_dtype=None):
    """Eval-mode FeedForward: x (B, T, n_embd) -> (B, T, n_embd).

    out_dtype=jnp.bfloat16 halves output DMA bytes (accuracy is already
    bf16-limited by the bf16 matmuls); default matches the input dtype.
    """
    od = np.dtype(x.dtype if out_dtype is None else out_dtype)
    return _feed_forward_impl(x, w1, b1, w2, b2,
                              tile_m=tile_m, tile_h=tile_h, out_dtype=od)


def init_params(key, n_embd):
    """Deterministic PyTorch-style (uniform +/- 1/sqrt(fan_in)) init."""
    hidden = 4 * n_embd
    k1, k2, k3, k4 = jax.random.split(key, 4)
    bound1 = 1.0 / jnp.sqrt(n_embd)
    bound2 = 1.0 / jnp.sqrt(hidden)
    # stored (in, out): transpose of torch's (out, in) weight layout
    w1 = jax.random.uniform(k1, (n_embd, hidden), jnp.float32, -bound1, bound1)
    b1 = jax.random.uniform(k2, (1, hidden), jnp.float32, -bound1, bound1)
    w2 = jax.random.uniform(k3, (hidden, n_embd), jnp.float32, -bound2, bound2)
    b2 = jax.random.uniform(k4, (1, n_embd), jnp.float32, -bound2, bound2)
    return w1, b1, w2, b2


if __name__ == "__main__":
    # bf16 matmuls with f32 accumulation -> compare to f32 ref with 2e-2 tol.
    TOL = dict(atol=2e-2, rtol=2e-2)

    def reference(x, w1, b1, w2, b2):
        h = jnp.maximum(
            jnp.einsum("btc,ch->bth", x, w1,
                       precision=jax.lax.Precision.HIGHEST) + b1, 0.0)
        return jnp.einsum("bth,hc->btc", h, w2,
                          precision=jax.lax.Precision.HIGHEST) + b2

    key = jax.random.PRNGKey(0)
    kx1, kx2, kx3, kx4, kx5, kp1, kp2 = jax.random.split(key, 7)

    # --- n_embd = 32 (hidden = 128) -------------------------------------
    N_EMBD = 32
    w1, b1, w2, b2 = init_params(kp1, N_EMBD)

    # 1) module-native small shape (grid = (1, 1), feature dim padded 32->128)
    x1 = jax.random.normal(kx1, (2, 8, N_EMBD), jnp.float32)
    o1 = jax.block_until_ready(feed_forward(x1, w1, b1, w2, b2))
    assert o1.shape == x1.shape and o1.dtype == x1.dtype
    assert jnp.allclose(o1, reference(x1, w1, b1, w2, b2), **TOL)

    # 2) multiple M tiles (M = 64, tile_m = 32 -> grid (2, 1), "parallel" axis)
    x2 = jax.random.normal(kx2, (4, 16, N_EMBD), jnp.float32)
    o2 = jax.block_until_ready(feed_forward(x2, w1, b1, w2, b2, tile_m=32))
    assert jnp.allclose(o2, reference(x2, w1, b1, w2, b2), **TOL)

    # 3) ragged M (B*T = 15): full-dim row block, no wrapper-side M padding
    x3 = jax.random.normal(kx3, (3, 5, N_EMBD), jnp.float32)
    o3 = jax.block_until_ready(feed_forward(x3, w1, b1, w2, b2))
    assert jnp.allclose(o3, reference(x3, w1, b1, w2, b2), **TOL)

    # 4) partial boundary M tile (M = 21, tile_m = 16 -> masked last block)
    x4 = jax.random.normal(kx4, (3, 7, N_EMBD), jnp.float32)
    o4 = jax.block_until_ready(feed_forward(x4, w1, b1, w2, b2, tile_m=16))
    assert jnp.allclose(o4, reference(x4, w1, b1, w2, b2), **TOL)

    # --- n_embd = 64 (hidden = 256): exercise the hidden-dim streaming axis
    N_EMBD2 = 64
    w1b, b1b, w2b, b2b = init_params(kp2, N_EMBD2)
    x5 = jax.random.normal(kx5, (2, 16, N_EMBD2), jnp.float32)
    # tile_h=128 -> 2 accumulation steps over the "arbitrary" h axis,
    # and a bf16 output to exercise the reduced-width output path.
    o5 = jax.block_until_ready(
        feed_forward(x5, w1b, b1b, w2b, b2b, tile_h=128, out_dtype=jnp.bfloat16))
    assert o5.dtype == jnp.bfloat16
    assert jnp.allclose(o5.astype(jnp.float32),
                        reference(x5, w1b, b1b, w2b, b2b), **TOL)

    print("KERNEL_OK")
</pallas_src>

<mosaic_0001>
module attributes {stable_mosaic.version = 11 : i64} {
  func.func @_ffwd_kernel(%arg0: i32, %arg1: i32, %arg2: memref<16x128xf32, #tpu.memory_space<vmem>>, %arg3: memref<128x128xbf16, #tpu.memory_space<vmem>>, %arg4: memref<1x128xf32, #tpu.memory_space<vmem>>, %arg5: memref<128x128xbf16, #tpu.memory_space<vmem>>, %arg6: memref<1x128xf32, #tpu.memory_space<vmem>>, %arg7: memref<16x128xf32, #tpu.memory_space<vmem>>, %arg8: memref<16x128xbf16, #tpu.memory_space<vmem>>, %arg9: memref<16x128xf32, #tpu.memory_space<vmem>>) attributes {dimension_semantics = [#tpu.dimension_semantics<parallel>, #tpu.dimension_semantics<arbitrary>], iteration_bounds = array<i64: 1, 1>, scalar_prefetch = 0 : i64, scratch_operands = 2 : i64, tpu.core_type = #tpu.core_type<tc>, window_params = [{transform_indices = @transform_0, window_bounds = array<i64: 16, 128>}, {transform_indices = @transform_1, window_bounds = array<i64: 128, 128>}, {transform_indices = @transform_2, window_bounds = array<i64: 1, 128>}, {transform_indices = @transform_3, window_bounds = array<i64: 128, 128>}, {pipeline_mode = #tpu.pipeline_mode<synchronous>, transform_indices = @transform_4, window_bounds = array<i64: 1, 128>}, {transform_indices = @transform_5, window_bounds = array<i64: 16, 128>}]} {
    %c0_i32 = arith.constant 0 : i32
    %0 = arith.cmpi eq, %arg1, %c0_i32 : i32
    %1 = arith.extui %0 : i1 to i32
    %c0_i32_0 = arith.constant 0 : i32
    %2 = arith.cmpi ne, %1, %c0_i32_0 : i32
    scf.if %2 {
      %c0_16 = arith.constant 0 : index
      %c0_17 = arith.constant 0 : index
      %20 = vector.load %arg2[%c0_16, %c0_17] : memref<16x128xf32, #tpu.memory_space<vmem>>, vector<16x128xf32>
      %21 = arith.truncf %20 : vector<16x128xf32> to vector<16x128xbf16>
      %c0_18 = arith.constant 0 : index
      %c0_19 = arith.constant 0 : index
      %22 = vector.load %arg8[%c0_18, %c0_19] : memref<16x128xbf16, #tpu.memory_space<vmem>>, vector<16x128xbf16>
      tpu.vector_store %arg8[%c0_18, %c0_19], %21 {strides = array<i32>} : memref<16x128xbf16, #tpu.memory_space<vmem>>, vector<16x128xbf16>,
      %cst_20 = arith.constant 0.000000e+00 : f32
      %23 = vector.broadcast %cst_20 : f32 to vector<16x128xf32>
      %c0_21 = arith.constant 0 : index
      %c0_22 = arith.constant 0 : index
      %24 = vector.load %arg9[%c0_21, %c0_22] : memref<16x128xf32, #tpu.memory_space<vmem>>, vector<16x128xf32>
      tpu.vector_store %arg9[%c0_21, %c0_22], %23 {strides = array<i32>} : memref<16x128xf32, #tpu.memory_space<vmem>>, vector<16x128xf32>,
    } else {
    }
    %c0 = arith.constant 0 : index
    %c0_1 = arith.constant 0 : index
    %3 = vector.load %arg8[%c0, %c0_1] : memref<16x128xbf16, #tpu.memory_space<vmem>>, vector<16x128xbf16>
    %c0_2 = arith.constant 0 : index
    %c0_3 = arith.constant 0 : index
    %4 = vector.load %arg3[%c0_2, %c0_3] : memref<128x128xbf16, #tpu.memory_space<vmem>>, vector<128x128xbf16>
    %cst = arith.constant dense<0.000000e+00> : vector<16x128xf32>
    %5 = tpu.matmul %3, %4, %cst {dimension_numbers = #tpu.dot_dimension_numbers<[1], [0], [0], [1], [0, 0, 1, 1], [], []>} : vector<16x128xbf16>, vector<128x128xbf16>, vector<16x128xf32> -> vector<16x128xf32>
    %c0_4 = arith.constant 0 : index
    %c0_5 = arith.constant 0 : index
    %6 = vector.load %arg4[%c0_4, %c0_5] : memref<1x128xf32, #tpu.memory_space<vmem>>, vector<1x128xf32>
    %7 = vector.broadcast %6 : vector<1x128xf32> to vector<16x128xf32>
    %8 = arith.addf %5, %7 : vector<16x128xf32>
    %cst_6 = arith.constant 0.000000e+00 : f32
    %9 = vector.broadcast %cst_6 : f32 to vector<16x128xf32>
    %10 = arith.maximumf %8, %9 : vector<16x128xf32>
    %c0_7 = arith.constant 0 : index
    %c0_8 = arith.constant 0 : index
    %11 = vector.load %arg9[%c0_7, %c0_8] : memref<16x128xf32, #tpu.memory_space<vmem>>, vector<16x128xf32>
    %12 = arith.truncf %10 : vector<16x128xf32> to vector<16x128xbf16>
    %c0_9 = arith.constant 0 : index
    %c0_10 = arith.constant 0 : index
    %13 = vector.load %arg5[%c0_9, %c0_10] : memref<128x128xbf16, #tpu.memory_space<vmem>>, vector<128x128xbf16>
    %cst_11 = arith.constant dense<0.000000e+00> : vector<16x128xf32>
    %14 = tpu.matmul %12, %13, %cst_11 {dimension_numbers = #tpu.dot_dimension_numbers<[1], [0], [0], [1], [0, 0, 1, 1], [], []>} : vector<16x128xbf16>, vector<128x128xbf16>, vector<16x128xf32> -> vector<16x128xf32>
    %15 = arith.addf %11, %14 : vector<16x128xf32>
    %c0_12 = arith.constant 0 : index
    %c0_13 = arith.constant 0 : index
    %16 = vector.load %arg9[%c0_12, %c0_13] : memref<16x128xf32, #tpu.memory_space<vmem>>, vector<16x128xf32>
    tpu.vector_store %arg9[%c0_12, %c0_13], %15 {strides = array<i32>} : memref<16x128xf32, #tpu.memory_space<vmem>>, vector<16x128xf32>,
    %c0_i32_14 = arith.constant 0 : i32
    %17 = arith.cmpi eq, %arg1, %c0_i32_14 : i32
    %18 = arith.extui %17 : i1 to i32
    %c0_i32_15 = arith.constant 0 : i32
    %19 = arith.cmpi ne, %18, %c0_i32_15 : i32
    scf.if %19 {
      %c0_16 = arith.constant 0 : index
      %c0_17 = arith.constant 0 : index
      %20 = vector.load %arg9[%c0_16, %c0_17] : memref<16x128xf32, #tpu.memory_space<vmem>>, vector<16x128xf32>
      %c0_18 = arith.constant 0 : index
      %c0_19 = arith.constant 0 : index
      %21 = vector.load %arg6[%c0_18, %c0_19] : memref<1x128xf32, #tpu.memory_space<vmem>>, vector<1x128xf32>
      %22 = vector.broadcast %21 : vector<1x128xf32> to vector<16x128xf32>
      %23 = arith.addf %20, %22 : vector<16x128xf32>
      %c0_20 = arith.constant 0 : index
      %c0_21 = arith.constant 0 : index
      %24 = vector.load %arg7[%c0_20, %c0_21] : memref<16x128xf32, #tpu.memory_space<vmem>>, vector<16x128xf32>
      tpu.vector_store %arg7[%c0_20, %c0_21], %23 {strides = array<i32>} : memref<16x128xf32, #tpu.memory_space<vmem>>, vector<16x128xf32>,
    } else {
    }
    return
  }
  func.func @transform_0(%arg0: i32, %arg1: i32) -> (i32, i32) {
    %c0_i32 = arith.constant 0 : i32
    %c0_i32_0 = arith.constant 0 : i32
    return %arg0, %c0_i32 : i32, i32
  }
  func.func @transform_1(%arg0: i32, %arg1: i32) -> (i32, i32) {
    %c0_i32 = arith.constant 0 : i32
    %c0_i32_0 = arith.constant 0 : i32
    return %c0_i32, %arg1 : i32, i32
  }
  func.func @transform_2(%arg0: i32, %arg1: i32) -> (i32, i32) {
    %c0_i32 = arith.constant 0 : i32
    %c0_i32_0 = arith.constant 0 : i32
    return %c0_i32, %arg1 : i32, i32
  }
  func.func @transform_3(%arg0: i32, %arg1: i32) -> (i32, i32) {
    %c0_i32 = arith.constant 0 : i32
    %c0_i32_0 = arith.constant 0 : i32
    return %arg1, %c0_i32 : i32, i32
  }
  func.func @transform_4(%arg0: i32, %arg1: i32) -> (i32, i32) {
    %c0_i32 = arith.constant 0 : i32
    %c0_i32_0 = arith.constant 0 : i32
    %c0_i32_1 = arith.constant 0 : i32
    return %c0_i32, %c0_i32_0 : i32, i32
  }
  func.func @transform_5(%arg0: i32, %arg1: i32) -> (i32, i32) {
    %c0_i32 = arith.constant 0 : i32
    %c0_i32_0 = arith.constant 0 : i32
    return %arg0, %c0_i32 : i32, i32
  }
}

</mosaic_0001>

<bundles_post_ra>
// kernel: _feed_forward_impl.1
= control target key start
LH: loop header
LB: loop body
LE: loop exit
PB: predicated region body
PF: predicated region fallthrough
CT: control target
= control target key end

     0   :  { %s414_s1 = inlined_call_operand.vmem [shape: bf16[128,128], index: 1, kind: input, shape index: {}]   ;;  %s415_s0 = inlined_call_operand.vmem [shape: f32[16,128], index: 0, kind: input, shape index: {}]   ;;  %s416_s3 = inlined_call_operand.vmem [shape: bf16[128,128], index: 3, kind: input, shape index: {}]   ;;  %s417_s2 = inlined_call_operand.vmem [shape: f32[1,128], index: 2, kind: input, shape index: {}]   ;;  %s418_s4 = inlined_call_operand.vmem [shape: f32[1,128], index: 4, kind: input, shape index: {}]   ;;  %s419_s5 = inlined_call_operand.vmem [shape: f32[16,128], index: 5, kind: output, shape index: {}]  }
   0x1   :  { %v302_v0 = vld [vmem:[%s414_s1 + $0x38] sm:$0xff]  ;;  %v301_v1 = vld [vmem:[%s414_s1 + $0x30] sm:$0xff]  ;;  %v24_v2 = vld [vmem:[%s415_s0] sm:$0xff] }
   0x2   :  { %108 = vmatpush.bf16.msra.mxu0 %v302_v0  ;;  %v25_v3 = vld [vmem:[%s415_s0 + $0x8] sm:$0xff]  ;;  %v310_v4 = vld [vmem:[%s416_s3 + $0x38] sm:$0xff]  ;;  %v309_v6 = vld [vmem:[%s416_s3 + $0x30] sm:$0xff] }
   0x3   :  { %v314_v5 = vpack.c.bf16 %v25_v3, %v24_v2  ;;  %191 = vmatpush.bf16.msra.mxu1 %v310_v4  ;;  %v300_v7 = vld [vmem:[%s414_s1 + $0x28] sm:$0xff]  ;;  %v299_v9 = vld [vmem:[%s414_s1 + $0x20] sm:$0xff]  ;;  %v298_v11 = vld [vmem:[%s414_s1 + $0x18] sm:$0xff] }
   0x4   :  { %v308_v8 = vld [vmem:[%s416_s3 + $0x28] sm:$0xff]  ;;  %v307_v10 = vld [vmem:[%s416_s3 + $0x20] sm:$0xff]  ;;  %v297_v12 = vld [vmem:[%s414_s1 + $0x10] sm:$0xff] }
   0x5   :  { %315 = vst [vmem:[#allocation2] sm:$0xff] %v314_v5   ;;  %v296_v13 = vld [vmem:[%s414_s1 + $0x8] sm:$0xff]  ;;  %v295_v14 = vld [vmem:[%s414_s1] sm:$0xff]  ;;  %v306_v16 = vld [vmem:[%s416_s3 + $0x18] sm:$0xff] }
   0x6   :  { %109 = vmatpush.bf16.msra.mxu0 %v301_v1  ;;  %v305_v17 = vld [vmem:[%s416_s3 + $0x10] sm:$0xff]  ;;  %v304_v18 = vld [vmem:[%s416_s3 + $0x8] sm:$0xff]  ;;  %v303_v19 = vld [vmem:[%s416_s3] sm:$0xff] }
   0x7   :  { %192 = vmatpush.bf16.msra.mxu1 %v309_v6  ;;  %v316_v21 = vld [vmem:[%s417_s2] ss:$0 sm:$0xff] }
   0x8   :  { %v317_v28 = vld [vmem:[%s418_s4] ss:$0 sm:$0xff] }
   0xa   :  { %110 = vmatpush.bf16.msra.mxu0 %v300_v7 }
   0xb   :  { %193 = vmatpush.bf16.msra.mxu1 %v308_v8 }
   0xc   :  { %v294_v15 = vld [vmem:[#allocation2] sm:$0xff] }
   0xe   :  { %111 = vmatpush.bf16.msra.mxu0 %v299_v9 }
   0xf   :  { %194 = vmatpush.bf16.msra.mxu1 %v307_v10 }
  0x12   :  { %112 = vmatpush.bf16.msra.mxu0 %v298_v11 }
  0x13   :  { %195 = vmatpush.bf16.msra.mxu1 %v306_v16 }
  0x16   :  { %113 = vmatpush.bf16.msra.mxu0 %v297_v12 }
  0x17   :  { %196 = vmatpush.bf16.msra.mxu1 %v305_v17 }
  0x1a   :  { %114 = vmatpush.bf16.msra.mxu0 %v296_v13 }
  0x1b   :  { %197 = vmatpush.bf16.msra.mxu1 %v304_v18 }
  0x1e   :  { %115 = vmatpush.bf16.msra.mxu0 %v295_v14 }
  0x1f   :  { %198 = vmatpush.bf16.msra.mxu1 %v303_v19 }
  0x21   :  { %116 = vmatmul.bf16.vlgmr.msra.gmra.mxu0 %v294_v15 }
  0x9e   :  { %v117_v20 = vpop.f32.mrf.mxu0 }
  0x9f   :  { %v118_v22 = vadd.f32 %v316_v21, %v117_v20 }
  0xa1   :  { %v122_v25 = vmax.f32 %v118_v22, 0.0 }
  0xa6   :  { %v119_v23 = vpop.f32.mrf.mxu0 }
  0xa7   :  { %v120_v24 = vadd.f32 %v316_v21, %v119_v23 }
  0xa9   :  { %v123_v26 = vmax.f32 %v120_v24, 0.0 }
  0xab   :  { %v126_v27 = vpack.c.bf16 %v123_v26, %v122_v25 }
  0xad   :  { %199 = vmatmul.bf16.vlgmr.msra.gmra.mxu1 %v126_v27 }
 0x12a   :  { %v200_v29 = vpop.f32.mrf.mxu1 }
 0x12b   :  { %v218_v30 = vadd.f32 %v317_v28, %v200_v29 }
 0x12d   :  { %220 = vst [vmem:[%s419_s5] sm:$0xff] %v218_v30 }
 0x132   :  { %v202_v31 = vpop.f32.mrf.mxu1 }
 0x133   :  { %v219_v32 = vadd.f32 %v317_v28, %v202_v31 }
 0x135   :  { %221 = vst [vmem:[%s419_s5 + $0x8] sm:$0xff] %v219_v32 }

</bundles_post_ra>
